<compile_context>
chip_gen: v5e
topology: v5e:2x2
jax: 0.10.0
libtpu: 0.0.40
codegen_flags: <defaults>
</compile_context>

<pallas_src>
import jax
import jax.numpy as jnp
from jax.experimental import pallas as pl
from jax.experimental.pallas import tpu as pltpu


def _round_up(n, m):
    return ((n + m - 1) // m) * m


def _linear_sigmoid_kernel(x_ref, w_ref, b_ref, o_ref):
    # Hot path: MXU matmul + VPU bias add + EUP tanh-based sigmoid, fused.
    y = jnp.dot(x_ref[...], w_ref[...], preferred_element_type=jnp.float32)
    y = y + b_ref[...]
    # sigmoid(y) == 0.5 * (tanh(y/2) + 1)  (exact identity; one EUP op)
    o_ref[...] = (0.5 * (jnp.tanh(0.5 * y) + 1.0)).astype(o_ref.dtype)


def module_d_forward(x, w3_t, b3, *, tm=512, use_bf16=False):
    """sigmoid(x @ w3_t + b3) as a gridded, lane-dense Pallas kernel.

    x:    [B, K]        float32 (K = 100 for ModuleD)
    w3_t: [K, D_out]    float32 (PyTorch weight [D_out, K] transposed)
    b3:   [D_out] or [1, D_out]
    """
    B, K = x.shape
    K2, D_out = w3_t.shape
    assert K == K2

    # Lane-dense / aligned padding (zero padding is exact for the matmul;
    # padded output columns / rows are sliced away below).
    K_pad = _round_up(K, 128)
    N_pad = _round_up(D_out, 128)

    # Batch tiling: large tiles amortize per-grid-step overhead; for tiny B
    # fall back to a single sublane-aligned tile.
    tm = min(tm, _round_up(B, 8))
    B_pad = _round_up(B, tm)
    grid = (B_pad // tm,)

    x_p = jnp.zeros((B_pad, K_pad), jnp.float32).at[:B, :K].set(x.astype(jnp.float32))
    w_p = jnp.zeros((K_pad, N_pad), jnp.float32).at[:K, :D_out].set(
        w3_t.astype(jnp.float32))
    b_p = jnp.zeros((1, N_pad), jnp.float32).at[:, :D_out].set(
        b3.reshape(1, D_out).astype(jnp.float32))

    if use_bf16:
        # For large-batch v6e/v7x: bf16 MXU operands, f32 accumulate/epilogue.
        x_p = x_p.astype(jnp.bfloat16)
        w_p = w_p.astype(jnp.bfloat16)

    out_padded = pl.pallas_call(
        _linear_sigmoid_kernel,
        out_shape=jax.ShapeDtypeStruct((B_pad, N_pad), jnp.float32),
        grid_spec=pltpu.PrefetchScalarGridSpec(
            num_scalar_prefetch=0,
            grid=grid,
            in_specs=[
                # x tile marches down the batch axis.
                pl.BlockSpec((tm, K_pad), lambda i: (i, 0)),
                # Weights / bias: constant block index -> stay resident in VMEM.
                pl.BlockSpec((K_pad, N_pad), lambda i: (0, 0)),
                pl.BlockSpec((1, N_pad), lambda i: (0, 0)),
            ],
            out_specs=pl.BlockSpec((tm, N_pad), lambda i: (i, 0)),
        ),
        compiler_params=pltpu.CompilerParams(
            # Batch rows are independent -> shard across v7x's 2 TensorCores.
            dimension_semantics=("parallel",),
        ),
    )(x_p, w_p, b_p)

    return out_padded[:B, :D_out].astype(x.dtype)


def init_params(key, D_in, D_out):
    """Deterministic init mirroring PyTorch Linear default (U(-1/sqrt(fan_in), +))."""
    ks = jax.random.split(key, 6)

    def linear_init(kw, kb, fan_in, fan_out):
        bound = 1.0 / jnp.sqrt(fan_in)
        w = jax.random.uniform(kw, (fan_out, fan_in), jnp.float32, -bound, bound)
        b = jax.random.uniform(kb, (fan_out,), jnp.float32, -bound, bound)
        return w, b

    # linear1, linear2 exist in __init__ but are unused in forward.
    w1, b1 = linear_init(ks[0], ks[1], D_in, 100)
    w2, b2 = linear_init(ks[2], ks[3], 100, 100)
    w3, b3 = linear_init(ks[4], ks[5], 100, D_out)
    return (w1, b1), (w2, b2), (w3, b3)


if __name__ == "__main__":
    D_in, D_out = 32, 16
    B = 8  # batch

    key = jax.random.PRNGKey(0)
    k_x, k_p = jax.random.split(key)

    # forward() applies linear3 directly to x, so x's last dim must be 100.
    x = jax.random.normal(k_x, (B, 100), jnp.float32)
    (_, _), (_, _), (w3, b3) = init_params(k_p, D_in, D_out)

    w3_t = jnp.transpose(w3)  # [100, D_out]

    out = module_d_forward(x, w3_t, b3)
    out = jax.block_until_ready(out)

    # Reference check (plain JAX) for correctness.
    ref = jax.nn.sigmoid(x @ w3_t + b3.reshape(1, D_out))
    assert out.shape == (B, D_out)
    assert jnp.allclose(out, ref, atol=1e-5, rtol=1e-5)

    print("KERNEL_OK")
</pallas_src>

<mosaic_0001>
module attributes {stable_mosaic.version = 11 : i64} {
  func.func @_linear_sigmoid_kernel(%arg0: i32, %arg1: memref<8x128xf32, #tpu.memory_space<vmem>>, %arg2: memref<128x128xf32, #tpu.memory_space<vmem>>, %arg3: memref<1x128xf32, #tpu.memory_space<vmem>>, %arg4: memref<8x128xf32, #tpu.memory_space<vmem>>) attributes {dimension_semantics = [#tpu.dimension_semantics<parallel>], iteration_bounds = array<i64: 1>, scalar_prefetch = 0 : i64, scratch_operands = 0 : i64, tpu.core_type = #tpu.core_type<tc>, window_params = [{transform_indices = @transform_0, window_bounds = array<i64: 8, 128>}, {pipeline_mode = #tpu.pipeline_mode<synchronous>, transform_indices = @transform_1, window_bounds = array<i64: 128, 128>}, {pipeline_mode = #tpu.pipeline_mode<synchronous>, transform_indices = @transform_2, window_bounds = array<i64: 1, 128>}, {transform_indices = @transform_3, window_bounds = array<i64: 8, 128>}]} {
    %c0 = arith.constant 0 : index
    %c0_0 = arith.constant 0 : index
    %0 = vector.load %arg1[%c0, %c0_0] : memref<8x128xf32, #tpu.memory_space<vmem>>, vector<8x128xf32>
    %c0_1 = arith.constant 0 : index
    %c0_2 = arith.constant 0 : index
    %1 = vector.load %arg2[%c0_1, %c0_2] : memref<128x128xf32, #tpu.memory_space<vmem>>, vector<128x128xf32>
    %cst = arith.constant dense<0.000000e+00> : vector<8x128xf32>
    %2 = tpu.matmul %0, %1, %cst {dimension_numbers = #tpu.dot_dimension_numbers<[1], [0], [0], [1], [0, 0, 1, 1], [], []>} : vector<8x128xf32>, vector<128x128xf32>, vector<8x128xf32> -> vector<8x128xf32>
    %c0_3 = arith.constant 0 : index
    %c0_4 = arith.constant 0 : index
    %3 = vector.load %arg3[%c0_3, %c0_4] : memref<1x128xf32, #tpu.memory_space<vmem>>, vector<1x128xf32>
    %4 = vector.broadcast %3 : vector<1x128xf32> to vector<8x128xf32>
    %5 = arith.addf %2, %4 : vector<8x128xf32>
    %cst_5 = arith.constant 5.000000e-01 : f32
    %6 = vector.broadcast %cst_5 : f32 to vector<8x128xf32>
    %7 = arith.mulf %6, %5 : vector<8x128xf32>
    %8 = math.tanh %7 : vector<8x128xf32>
    %cst_6 = arith.constant 1.000000e+00 : f32
    %9 = vector.broadcast %cst_6 : f32 to vector<8x128xf32>
    %10 = arith.addf %8, %9 : vector<8x128xf32>
    %cst_7 = arith.constant 5.000000e-01 : f32
    %11 = vector.broadcast %cst_7 : f32 to vector<8x128xf32>
    %12 = arith.mulf %11, %10 : vector<8x128xf32>
    %c0_8 = arith.constant 0 : index
    %c0_9 = arith.constant 0 : index
    %13 = vector.load %arg4[%c0_8, %c0_9] : memref<8x128xf32, #tpu.memory_space<vmem>>, vector<8x128xf32>
    tpu.vector_store %arg4[%c0_8, %c0_9], %12 {strides = array<i32>} : memref<8x128xf32, #tpu.memory_space<vmem>>, vector<8x128xf32>,
    return
  }
  func.func @transform_0(%arg0: i32) -> (i32, i32) {
    %c0_i32 = arith.constant 0 : i32
    %c0_i32_0 = arith.constant 0 : i32
    return %arg0, %c0_i32 : i32, i32
  }
  func.func @transform_1(%arg0: i32) -> (i32, i32) {
    %c0_i32 = arith.constant 0 : i32
    %c0_i32_0 = arith.constant 0 : i32
    %c0_i32_1 = arith.constant 0 : i32
    return %c0_i32, %c0_i32_0 : i32, i32
  }
  func.func @transform_2(%arg0: i32) -> (i32, i32) {
    %c0_i32 = arith.constant 0 : i32
    %c0_i32_0 = arith.constant 0 : i32
    %c0_i32_1 = arith.constant 0 : i32
    return %c0_i32, %c0_i32_0 : i32, i32
  }
  func.func @transform_3(%arg0: i32) -> (i32, i32) {
    %c0_i32 = arith.constant 0 : i32
    %c0_i32_0 = arith.constant 0 : i32
    return %arg0, %c0_i32 : i32, i32
  }
}

</mosaic_0001>

<bundles_post_ra>
// kernel: tpu_custom_call.1
= control target key start
LH: loop header
LB: loop body
LE: loop exit
PB: predicated region body
PF: predicated region fallthrough
CT: control target
= control target key end

     0   :  { %8 = vsyncpa [#allocation3], 0  ;;  %s232_s0 = inlined_call_operand.hbm [shape: f32[8,128], index: 0, kind: input, shape index: {}]   ;;  %s233_s1 = inlined_call_operand.hbm [shape: f32[128,128], index: 1, kind: input, shape index: {}]   ;;  %s234_s2 = inlined_call_operand.vmem [shape: f32[1,128], index: 2, kind: input, shape index: {}]   ;;  %s235_s3 = inlined_call_operand.hbm [shape: f32[8,128], index: 3, kind: output, shape index: {}]  }
   0x1   :  { %9 = vsyncpa [#allocation6], 0 }
   0x2   :  { %10 = vsyncpa [#allocation4], 0  ;;  %s16_s14 = sshll.u32 %s232_s0, 4  ;;  %s195_s15 = smov [#allocation2]   ;;  %s17_s14 = int_to_ptr.hbm [resolvable:$true] %s16_s14 }
   0x3   :  { %s18_s16 = sshll.u32 %s195_s15, 4  ;;  %s26_s19 = sshll.u32 %s233_s1, 4  ;;  %s19_s16 = int_to_ptr.vmem [resolvable:$true] %s18_s16  ;;  %s27_s19 = int_to_ptr.hbm [resolvable:$true] %s26_s19 }
   0x4   :  { %21 = dma.hbm_to_vmem [thread:$0]  %s17_s14, 128, %s19_s16, [#allocation3]  }
   0x5   :  { %s196_s20 = smov [#allocation5]   ;;  %s197_s22 = smov 128  }
   0x6   :  { %s28_s21 = sshll.u32 %s196_s20, 4  ;;  %s198_s23 = smov 8   ;;  %s29_s21 = int_to_ptr.vmem [resolvable:$true] %s28_s21 }
   0x7   :  { %34 = dma.hbm_to_vmem [thread:$0]  %s27_s19, 2048, %s29_s21, [#allocation6], %s197_s22, %s197_s22, %s198_s23  }
   0x8   :  { %189 = dma.done.wait [#allocation3], 128  }
   0x9   :  { %190 = vsyncadd [#allocation3], 4294967168 }
   0xa   :  { %191 = dma.done.wait [#allocation6], 2048  }
   0xb   :  { %192 = vsyncadd [#allocation6], 4294965248  ;;  %v61_v0 = vld [vmem:[#allocation5 + $0x78] sm:$0xff]  ;;  %v60_v1 = vld [vmem:[#allocation5 + $0x70] sm:$0xff]  ;;  %s199_s24 = smov [#allocation7]   ;;  %s98_s28 = sshll.u32 %s235_s3, 4  ;;  %s99_s28 = int_to_ptr.hbm [resolvable:$true] %s98_s28 }
   0xc   :  { %66 = vmatpush.msra.mxu0 %v61_v0  ;;  %v59_v2 = vld [vmem:[#allocation5 + $0x68] sm:$0xff]  ;;  %v58_v3 = vld [vmem:[#allocation5 + $0x60] sm:$0xff]  ;;  %v57_v4 = vld [vmem:[#allocation5 + $0x58] sm:$0xff]  ;;  %s96_s25 = sshll.u32 %s199_s24, 4  ;;  %s97_s25 = int_to_ptr.vmem [resolvable:$true] %s96_s25 }
   0xd   :  { %v56_v5 = vld [vmem:[#allocation5 + $0x50] sm:$0xff]  ;;  %v55_v6 = vld [vmem:[#allocation5 + $0x48] sm:$0xff]  ;;  %v54_v7 = vld [vmem:[#allocation5 + $0x40] sm:$0xff] }
   0xe   :  { %67 = vmatpush.msra.mxu0 %v60_v1  ;;  %v53_v8 = vld [vmem:[#allocation5 + $0x38] sm:$0xff]  ;;  %v52_v9 = vld [vmem:[#allocation5 + $0x30] sm:$0xff]  ;;  %v51_v10 = vld [vmem:[#allocation5 + $0x28] sm:$0xff] }
   0xf   :  { %v50_v11 = vld [vmem:[#allocation5 + $0x20] sm:$0xff]  ;;  %v49_v12 = vld [vmem:[#allocation5 + $0x18] sm:$0xff]  ;;  %v48_v13 = vld [vmem:[#allocation5 + $0x10] sm:$0xff] }
  0x10   :  { %68 = vmatpush.msra.mxu0 %v59_v2  ;;  %v47_v14 = vld [vmem:[#allocation5 + $0x8] sm:$0xff]  ;;  %v46_v15 = vld [vmem:[#allocation5] sm:$0xff]  ;;  %v45_v16 = vld [vmem:[#allocation2] sm:$0xff] }
  0x11   :  { %v114_v17 = vld [vmem:[%s234_s2] ss:$0 sm:$0xff] }
  0x12   :  { %69 = vmatpush.msra.mxu0 %v58_v3 }
  0x14   :  { %70 = vmatpush.msra.mxu0 %v57_v4 }
  0x16   :  { %71 = vmatpush.msra.mxu0 %v56_v5 }
  0x18   :  { %72 = vmatpush.msra.mxu0 %v55_v6 }
  0x1a   :  { %73 = vmatpush.msra.mxu0 %v54_v7 }
  0x1c   :  { %74 = vmatpush.msra.mxu0 %v53_v8 }
  0x1e   :  { %75 = vmatpush.msra.mxu0 %v52_v9 }
  0x20   :  { %76 = vmatpush.msra.mxu0 %v51_v10 }
  0x22   :  { %77 = vmatpush.msra.mxu0 %v50_v11 }
  0x24   :  { %78 = vmatpush.msra.mxu0 %v49_v12 }
  0x26   :  { %79 = vmatpush.msra.mxu0 %v48_v13 }
  0x28   :  { %80 = vmatpush.msra.mxu0 %v47_v14 }
  0x2a   :  { %81 = vmatpush.msra.mxu0 %v46_v15 }
  0x2b   :  { %82 = vmatmul.f32.vlgmr.msra.gmra.mxu0 %v45_v16 }
  0xa8   :  { %v83_v18 = vpop.f32.mrf.mxu0 }
  0xa9   :  { %v84_v19 = vadd.f32 %v114_v17, %v83_v18 }
  0xab   :  { %v86_v20 = vmul.f32 0.5, %v84_v19 }
  0xad   :  { %115 = vtanh.f32 %v86_v20 }
  0xb3   :  { %v116_v21 = vpop.eup %115 }
  0xb4   :  { %v88_v22 = vadd.f32 1.0, %v116_v21 }
  0xb6   :  { %v89_v23 = vmul.f32 0.5, %v88_v22 }
  0xb8   :  { %90 = vst [vmem:[#allocation7] sm:$0xff] %v89_v23 }
  0xb9   :  { %101 = dma.vmem_to_hbm [thread:$0]  %s97_s25, 128, %s99_s28, [#allocation4]  }
  0xba   :  { %193 = dma.done.wait [#allocation4], 128  }
  0xbb   :  { %194 = vsyncadd [#allocation4], 4294967168 }
  0xbc   :  { %106 = vsyncpa [#allocation3], 1 }
  0xbd   :  { %107 = vsyncpa [#allocation6], 1 }
  0xbe   :  { %108 = vsyncpa [#allocation4], 1 }

</bundles_post_ra>
